<compile_context>
chip_gen: v7x
topology: tpu7x:2x2x1
jax: 0.10.0
libtpu: 0.0.40
codegen_flags: <defaults>
</compile_context>

<pallas_src>
import functools

import jax
import jax.numpy as jnp
from jax import lax
from jax.experimental import pallas as pl
from jax.experimental.pallas import tpu as pltpu

N_OPS = 3          # number of candidate ops in the layer choice
KH = KW = 3        # each candidate op: Conv2d(Cin, Cout, 3, padding=1)


def _conv3x3_path_sum_kernel(x_ref, w_ref, b_ref, o_ref, *, width):
    """Fused 3x3 SAME conv with mask-collapsed weights; one image per step.

    x_ref : VMEM f32[Cin, H*W + 2*width + 2]  row-major flattened image with
                                              (width+1) zeros of halo on each
                                              end (covers the top/bottom pad)
    w_ref : VMEM f32[9, Cout, Cin]            mask-collapsed taps, k = dy*3+dx
    b_ref : VMEM f32[Cout, 1]                 mask-collapsed bias
    o_ref : VMEM f32[Cout, H*W]               NCHW output block (flat h*w)
    """
    hw = o_ref.shape[-1]

    # Horizontal-edge lane masks: the dx=0 (left) taps are invalid where
    # w == 0 and the dx=2 (right) taps where w == width-1 (those reads wrap
    # into the neighbouring row of the flattened image).  A handful of VPU
    # ops on in-register data -- cheaper than shipping padded garbage columns
    # to HBM and slicing them off afterwards.
    col = lax.broadcasted_iota(jnp.int32, (1, hw), 1) % width
    not_left = col != 0
    not_right = col != (width - 1)

    def tap(dy, dx):
        # Flat-index shift of tap (dy, dx) relative to the halo'd image start.
        start = dy * width + dx                       # static lane offset
        return jnp.dot(w_ref[dy * 3 + dx],
                       x_ref[:, start:start + hw],
                       preferred_element_type=jnp.float32)

    col_l = tap(0, 0) + tap(1, 0) + tap(2, 0)         # kernel column dx = 0
    col_m = tap(0, 1) + tap(1, 1) + tap(2, 1)         # kernel column dx = 1
    col_r = tap(0, 2) + tap(1, 2) + tap(2, 2)         # kernel column dx = 2

    acc = (col_m
           + jnp.where(not_left, col_l, 0.0)
           + jnp.where(not_right, col_r, 0.0)
           + b_ref[...])
    o_ref[...] = acc.astype(o_ref.dtype)


@jax.jit
def path_sampling_layer_choice(x_nchw, weights_hwio, biases, mask):
    """Forward of PathSamplingLayerChoice (sum of the sampled conv paths).

    x_nchw       : f32[B, Cin, H, W]                (PyTorch layout)
    weights_hwio : f32[N_OPS, KH, KW, Cin, Cout]
    biases       : f32[N_OPS, Cout]
    mask         : f32[N_OPS]  multi-hot (1.0 for each sampled op)
    returns      : f32[B, Cout, H, W]
    """
    B, Cin, H, W = x_nchw.shape
    Cout = weights_hwio.shape[-1]
    HW = H * W
    halo = W + 1                                     # 1-row zero halo each end

    # --- hoisted mask-weighted collapse (linearity of conv): one conv total ---
    w_sum = jnp.tensordot(mask, weights_hwio, axes=1)            # [KH,KW,Cin,Cout]
    w_taps = jnp.transpose(w_sum.reshape(KH * KW, Cin, Cout),
                           (0, 2, 1))                            # [9, Cout, Cin]
    b_sum = (mask @ biases).reshape(Cout, 1)                     # [Cout, 1]

    # --- only wrapper-side activation movement: free reshape + tiny 1-D pad ---
    x_flat = x_nchw.reshape(B, Cin, HW)
    x_halo = jnp.pad(x_flat, ((0, 0), (0, 0), (halo, halo)))     # [B,Cin,HW+2W+2]

    out_flat = pl.pallas_call(
        functools.partial(_conv3x3_path_sum_kernel, width=W),
        out_shape=jax.ShapeDtypeStruct((B, Cout, HW), jnp.float32),
        grid=(B,),
        in_specs=[
            # one halo'd image per step; lane dim = flattened spatial (dense)
            pl.BlockSpec((None, Cin, HW + 2 * halo), lambda b: (b, 0, 0)),
            # collapsed weights/bias: constant index map -> fetched once, resident
            pl.BlockSpec((KH * KW, Cout, Cin), lambda b: (0, 0, 0)),
            pl.BlockSpec((Cout, 1), lambda b: (0, 0)),
        ],
        out_specs=pl.BlockSpec((None, Cout, HW), lambda b: (b, 0, 0)),
        compiler_params=pltpu.CompilerParams(
            dimension_semantics=("parallel",),   # batch grid -> v7x megacore
        ),
    )(x_halo, w_taps, b_sum)

    # Contiguous reshape only -- output is already NCHW, no epilogue transpose.
    return out_flat.reshape(B, Cout, H, W)


def _reference(x_nchw, weights_hwio, biases, sampled):
    """Pure-JAX reference: sum of lax.conv over the sampled ops."""
    x_nhwc = jnp.transpose(x_nchw, (0, 2, 3, 1))
    acc = None
    for i in sampled:
        y = lax.conv_general_dilated(
            x_nhwc, weights_hwio[i], window_strides=(1, 1), padding="SAME",
            dimension_numbers=("NHWC", "HWIO", "NHWC"))
        y = y + biases[i][None, None, None, :]
        acc = y if acc is None else acc + y
    return jnp.transpose(acc, (0, 3, 1, 2))


if __name__ == "__main__":
    key = jax.random.PRNGKey(0)
    B, Cin, Cout, H, W = 2, 4, 4, 16, 16

    kx, kw, kb = jax.random.split(key, 3)
    x = jax.random.normal(kx, (B, Cin, H, W), dtype=jnp.float32)
    weights = 0.1 * jax.random.normal(
        kw, (N_OPS, KH, KW, Cin, Cout), dtype=jnp.float32)
    biases = 0.1 * jax.random.normal(kb, (N_OPS, Cout), dtype=jnp.float32)

    # Multi-path branch: self.sampled = [0, 2]  -> outputs of op0 + op2.
    sampled = [0, 2]
    mask = jnp.zeros((N_OPS,), jnp.float32).at[jnp.array(sampled)].set(1.0)
    out = jax.block_until_ready(
        path_sampling_layer_choice(x, weights, biases, mask))
    ref = jax.block_until_ready(_reference(x, weights, biases, sampled))
    assert out.shape == (B, Cout, H, W)
    assert jnp.allclose(out, ref, atol=1e-4, rtol=1e-4)

    # Single-path branch: self.sampled = 1 (one-hot mask).
    mask1 = jnp.zeros((N_OPS,), jnp.float32).at[1].set(1.0)
    out1 = jax.block_until_ready(
        path_sampling_layer_choice(x, weights, biases, mask1))
    ref1 = jax.block_until_ready(_reference(x, weights, biases, [1]))
    assert jnp.allclose(out1, ref1, atol=1e-4, rtol=1e-4)

    print("KERNEL_OK")
</pallas_src>

<mosaic_0001>
module attributes {stable_mosaic.version = 11 : i64} {
  func.func @_conv3x3_path_sum_kernel(%arg0: i32, %arg1: memref<1x4x290xf32, #tpu.memory_space<vmem>>, %arg2: memref<9x4x4xf32, #tpu.memory_space<vmem>>, %arg3: memref<4x1xf32, #tpu.memory_space<vmem>>, %arg4: memref<1x4x256xf32, #tpu.memory_space<vmem>>) attributes {dimension_semantics = [#tpu.dimension_semantics<parallel>], iteration_bounds = array<i64: 2>, scalar_prefetch = 0 : i64, scratch_operands = 0 : i64, tpu.core_type = #tpu.core_type<tc>, window_params = [{transform_indices = @transform_0, window_bounds = array<i64: 1, 4, 290>}, {pipeline_mode = #tpu.pipeline_mode<synchronous>, transform_indices = @transform_1, window_bounds = array<i64: 9, 4, 4>}, {pipeline_mode = #tpu.pipeline_mode<synchronous>, transform_indices = @transform_2, window_bounds = array<i64: 4, 1>}, {transform_indices = @transform_3, window_bounds = array<i64: 1, 4, 256>}]} {
    %0 = tpu.iota {dimensions = array<i32: 1>} : vector<1x256xi32>
    %c16_i32 = arith.constant 16 : i32
    %c0_i32 = arith.constant 0 : i32
    %1 = arith.cmpi eq, %c16_i32, %c0_i32 : i32
    %c1_i32 = arith.constant 1 : i32
    %2 = arith.select %1, %c1_i32, %c16_i32 : i32
    %3 = vector.broadcast %2 : i32 to vector<1x256xi32>
    %4 = arith.remsi %0, %3 : vector<1x256xi32>
    %c0_i32_0 = arith.constant 0 : i32
    %5 = vector.broadcast %c0_i32_0 : i32 to vector<1x256xi32>
    %6 = arith.cmpi ne, %4, %5 : vector<1x256xi32>
    %c0_i32_1 = arith.constant 0 : i32
    %7 = vector.broadcast %c0_i32_1 : i32 to vector<1x256xi32>
    %8 = arith.cmpi slt, %4, %7 : vector<1x256xi32>
    %c0_i32_2 = arith.constant 0 : i32
    %9 = arith.cmpi slt, %2, %c0_i32_2 : i32
    %10 = vector.broadcast %9 : i1 to vector<1x256xi1>
    %11 = vector.broadcast %10 : vector<1x256xi1> to vector<1x256xi1>
    %12 = arith.xori %8, %11 : vector<1x256xi1>
    %13 = arith.andi %12, %6 : vector<1x256xi1>
    %14 = vector.broadcast %2 : i32 to vector<1x256xi32>
    %15 = arith.addi %4, %14 : vector<1x256xi32>
    %16 = arith.select %13, %15, %4 : vector<1x256xi1>, vector<1x256xi32>
    %c0_i32_3 = arith.constant 0 : i32
    %17 = vector.broadcast %c0_i32_3 : i32 to vector<1x256xi32>
    %18 = arith.cmpi ne, %16, %17 : vector<1x256xi32>
    %c15_i32 = arith.constant 15 : i32
    %19 = vector.broadcast %c15_i32 : i32 to vector<1x256xi32>
    %20 = arith.cmpi ne, %16, %19 : vector<1x256xi32>
    %c0 = arith.constant 0 : index
    %c0_4 = arith.constant 0 : index
    %c0_5 = arith.constant 0 : index
    %21 = vector.load %arg2[%c0, %c0_4, %c0_5] : memref<9x4x4xf32, #tpu.memory_space<vmem>>, vector<1x4x4xf32>
    %22 = vector.shape_cast %21 : vector<1x4x4xf32> to vector<4x4xf32>
    %c0_6 = arith.constant 0 : index
    %c0_7 = arith.constant 0 : index
    %c0_8 = arith.constant 0 : index
    %23 = vector.load %arg1[%c0_6, %c0_7, %c0_8] : memref<1x4x290xf32, #tpu.memory_space<vmem>>, vector<1x4x256xf32>
    %24 = vector.shape_cast %23 : vector<1x4x256xf32> to vector<4x256xf32>
    %cst = arith.constant dense<0.000000e+00> : vector<4x256xf32>
    %25 = tpu.matmul %22, %24, %cst {dimension_numbers = #tpu.dot_dimension_numbers<[1], [0], [0], [1], [0, 0, 1, 1], [], []>} : vector<4x4xf32>, vector<4x256xf32>, vector<4x256xf32> -> vector<4x256xf32>
    %c3 = arith.constant 3 : index
    %c0_9 = arith.constant 0 : index
    %c0_10 = arith.constant 0 : index
    %26 = vector.load %arg2[%c3, %c0_9, %c0_10] : memref<9x4x4xf32, #tpu.memory_space<vmem>>, vector<1x4x4xf32>
    %27 = vector.shape_cast %26 : vector<1x4x4xf32> to vector<4x4xf32>
    %c0_11 = arith.constant 0 : index
    %c0_12 = arith.constant 0 : index
    %c16 = arith.constant 16 : index
    %28 = vector.load %arg1[%c0_11, %c0_12, %c16] : memref<1x4x290xf32, #tpu.memory_space<vmem>>, vector<1x4x256xf32>
    %29 = vector.shape_cast %28 : vector<1x4x256xf32> to vector<4x256xf32>
    %cst_13 = arith.constant dense<0.000000e+00> : vector<4x256xf32>
    %30 = tpu.matmul %27, %29, %cst_13 {dimension_numbers = #tpu.dot_dimension_numbers<[1], [0], [0], [1], [0, 0, 1, 1], [], []>} : vector<4x4xf32>, vector<4x256xf32>, vector<4x256xf32> -> vector<4x256xf32>
    %31 = arith.addf %25, %30 : vector<4x256xf32>
    %c6 = arith.constant 6 : index
    %c0_14 = arith.constant 0 : index
    %c0_15 = arith.constant 0 : index
    %32 = vector.load %arg2[%c6, %c0_14, %c0_15] : memref<9x4x4xf32, #tpu.memory_space<vmem>>, vector<1x4x4xf32>
    %33 = vector.shape_cast %32 : vector<1x4x4xf32> to vector<4x4xf32>
    %c0_16 = arith.constant 0 : index
    %c0_17 = arith.constant 0 : index
    %c32 = arith.constant 32 : index
    %34 = vector.load %arg1[%c0_16, %c0_17, %c32] : memref<1x4x290xf32, #tpu.memory_space<vmem>>, vector<1x4x256xf32>
    %35 = vector.shape_cast %34 : vector<1x4x256xf32> to vector<4x256xf32>
    %cst_18 = arith.constant dense<0.000000e+00> : vector<4x256xf32>
    %36 = tpu.matmul %33, %35, %cst_18 {dimension_numbers = #tpu.dot_dimension_numbers<[1], [0], [0], [1], [0, 0, 1, 1], [], []>} : vector<4x4xf32>, vector<4x256xf32>, vector<4x256xf32> -> vector<4x256xf32>
    %37 = arith.addf %31, %36 : vector<4x256xf32>
    %c1 = arith.constant 1 : index
    %c0_19 = arith.constant 0 : index
    %c0_20 = arith.constant 0 : index
    %38 = vector.load %arg2[%c1, %c0_19, %c0_20] : memref<9x4x4xf32, #tpu.memory_space<vmem>>, vector<1x4x4xf32>
    %39 = vector.shape_cast %38 : vector<1x4x4xf32> to vector<4x4xf32>
    %c0_21 = arith.constant 0 : index
    %c0_22 = arith.constant 0 : index
    %c1_23 = arith.constant 1 : index
    %40 = vector.load %arg1[%c0_21, %c0_22, %c1_23] : memref<1x4x290xf32, #tpu.memory_space<vmem>>, vector<1x4x256xf32>
    %41 = vector.shape_cast %40 : vector<1x4x256xf32> to vector<4x256xf32>
    %cst_24 = arith.constant dense<0.000000e+00> : vector<4x256xf32>
    %42 = tpu.matmul %39, %41, %cst_24 {dimension_numbers = #tpu.dot_dimension_numbers<[1], [0], [0], [1], [0, 0, 1, 1], [], []>} : vector<4x4xf32>, vector<4x256xf32>, vector<4x256xf32> -> vector<4x256xf32>
    %c4 = arith.constant 4 : index
    %c0_25 = arith.constant 0 : index
    %c0_26 = arith.constant 0 : index
    %43 = vector.load %arg2[%c4, %c0_25, %c0_26] : memref<9x4x4xf32, #tpu.memory_space<vmem>>, vector<1x4x4xf32>
    %44 = vector.shape_cast %43 : vector<1x4x4xf32> to vector<4x4xf32>
    %c0_27 = arith.constant 0 : index
    %c0_28 = arith.constant 0 : index
    %c17 = arith.constant 17 : index
    %45 = vector.load %arg1[%c0_27, %c0_28, %c17] : memref<1x4x290xf32, #tpu.memory_space<vmem>>, vector<1x4x256xf32>
    %46 = vector.shape_cast %45 : vector<1x4x256xf32> to vector<4x256xf32>
    %cst_29 = arith.constant dense<0.000000e+00> : vector<4x256xf32>
    %47 = tpu.matmul %44, %46, %cst_29 {dimension_numbers = #tpu.dot_dimension_numbers<[1], [0], [0], [1], [0, 0, 1, 1], [], []>} : vector<4x4xf32>, vector<4x256xf32>, vector<4x256xf32> -> vector<4x256xf32>
    %48 = arith.addf %42, %47 : vector<4x256xf32>
    %c7 = arith.constant 7 : index
    %c0_30 = arith.constant 0 : index
    %c0_31 = arith.constant 0 : index
    %49 = vector.load %arg2[%c7, %c0_30, %c0_31] : memref<9x4x4xf32, #tpu.memory_space<vmem>>, vector<1x4x4xf32>
    %50 = vector.shape_cast %49 : vector<1x4x4xf32> to vector<4x4xf32>
    %c0_32 = arith.constant 0 : index
    %c0_33 = arith.constant 0 : index
    %c33 = arith.constant 33 : index
    %51 = vector.load %arg1[%c0_32, %c0_33, %c33] : memref<1x4x290xf32, #tpu.memory_space<vmem>>, vector<1x4x256xf32>
    %52 = vector.shape_cast %51 : vector<1x4x256xf32> to vector<4x256xf32>
    %cst_34 = arith.constant dense<0.000000e+00> : vector<4x256xf32>
    %53 = tpu.matmul %50, %52, %cst_34 {dimension_numbers = #tpu.dot_dimension_numbers<[1], [0], [0], [1], [0, 0, 1, 1], [], []>} : vector<4x4xf32>, vector<4x256xf32>, vector<4x256xf32> -> vector<4x256xf32>
    %54 = arith.addf %48, %53 : vector<4x256xf32>
    %c2 = arith.constant 2 : index
    %c0_35 = arith.constant 0 : index
    %c0_36 = arith.constant 0 : index
    %55 = vector.load %arg2[%c2, %c0_35, %c0_36] : memref<9x4x4xf32, #tpu.memory_space<vmem>>, vector<1x4x4xf32>
    %56 = vector.shape_cast %55 : vector<1x4x4xf32> to vector<4x4xf32>
    %c0_37 = arith.constant 0 : index
    %c0_38 = arith.constant 0 : index
    %c2_39 = arith.constant 2 : index
    %57 = vector.load %arg1[%c0_37, %c0_38, %c2_39] : memref<1x4x290xf32, #tpu.memory_space<vmem>>, vector<1x4x256xf32>
    %58 = vector.shape_cast %57 : vector<1x4x256xf32> to vector<4x256xf32>
    %cst_40 = arith.constant dense<0.000000e+00> : vector<4x256xf32>
    %59 = tpu.matmul %56, %58, %cst_40 {dimension_numbers = #tpu.dot_dimension_numbers<[1], [0], [0], [1], [0, 0, 1, 1], [], []>} : vector<4x4xf32>, vector<4x256xf32>, vector<4x256xf32> -> vector<4x256xf32>
    %c5 = arith.constant 5 : index
    %c0_41 = arith.constant 0 : index
    %c0_42 = arith.constant 0 : index
    %60 = vector.load %arg2[%c5, %c0_41, %c0_42] : memref<9x4x4xf32, #tpu.memory_space<vmem>>, vector<1x4x4xf32>
    %61 = vector.shape_cast %60 : vector<1x4x4xf32> to vector<4x4xf32>
    %c0_43 = arith.constant 0 : index
    %c0_44 = arith.constant 0 : index
    %c18 = arith.constant 18 : index
    %62 = vector.load %arg1[%c0_43, %c0_44, %c18] : memref<1x4x290xf32, #tpu.memory_space<vmem>>, vector<1x4x256xf32>
    %63 = vector.shape_cast %62 : vector<1x4x256xf32> to vector<4x256xf32>
    %cst_45 = arith.constant dense<0.000000e+00> : vector<4x256xf32>
    %64 = tpu.matmul %61, %63, %cst_45 {dimension_numbers = #tpu.dot_dimension_numbers<[1], [0], [0], [1], [0, 0, 1, 1], [], []>} : vector<4x4xf32>, vector<4x256xf32>, vector<4x256xf32> -> vector<4x256xf32>
    %65 = arith.addf %59, %64 : vector<4x256xf32>
    %c8 = arith.constant 8 : index
    %c0_46 = arith.constant 0 : index
    %c0_47 = arith.constant 0 : index
    %66 = vector.load %arg2[%c8, %c0_46, %c0_47] : memref<9x4x4xf32, #tpu.memory_space<vmem>>, vector<1x4x4xf32>
    %67 = vector.shape_cast %66 : vector<1x4x4xf32> to vector<4x4xf32>
    %c0_48 = arith.constant 0 : index
    %c0_49 = arith.constant 0 : index
    %c34 = arith.constant 34 : index
    %68 = vector.load %arg1[%c0_48, %c0_49, %c34] : memref<1x4x290xf32, #tpu.memory_space<vmem>>, vector<1x4x256xf32>
    %69 = vector.shape_cast %68 : vector<1x4x256xf32> to vector<4x256xf32>
    %cst_50 = arith.constant dense<0.000000e+00> : vector<4x256xf32>
    %70 = tpu.matmul %67, %69, %cst_50 {dimension_numbers = #tpu.dot_dimension_numbers<[1], [0], [0], [1], [0, 0, 1, 1], [], []>} : vector<4x4xf32>, vector<4x256xf32>, vector<4x256xf32> -> vector<4x256xf32>
    %71 = arith.addf %65, %70 : vector<4x256xf32>
    %cst_51 = arith.constant 0.000000e+00 : f32
    %72 = vector.shape_cast %18 : vector<1x256xi1> to vector<1x256xi1>
    %73 = vector.broadcast %72 : vector<1x256xi1> to vector<4x256xi1>
    %74 = vector.broadcast %cst_51 : f32 to vector<4x256xf32>
    %75 = arith.select %73, %37, %74 : vector<4x256xi1>, vector<4x256xf32>
    %76 = arith.addf %54, %75 : vector<4x256xf32>
    %cst_52 = arith.constant 0.000000e+00 : f32
    %77 = vector.shape_cast %20 : vector<1x256xi1> to vector<1x256xi1>
    %78 = vector.broadcast %77 : vector<1x256xi1> to vector<4x256xi1>
    %79 = vector.broadcast %cst_52 : f32 to vector<4x256xf32>
    %80 = arith.select %78, %71, %79 : vector<4x256xi1>, vector<4x256xf32>
    %81 = arith.addf %76, %80 : vector<4x256xf32>
    %c0_53 = arith.constant 0 : index
    %c0_54 = arith.constant 0 : index
    %82 = vector.load %arg3[%c0_53, %c0_54] : memref<4x1xf32, #tpu.memory_space<vmem>>, vector<4x1xf32>
    %83 = vector.broadcast %82 : vector<4x1xf32> to vector<4x256xf32>
    %84 = arith.addf %81, %83 : vector<4x256xf32>
    %c0_55 = arith.constant 0 : index
    %c0_56 = arith.constant 0 : index
    %c0_57 = arith.constant 0 : index
    %85 = vector.load %arg4[%c0_55, %c0_56, %c0_57] : memref<1x4x256xf32, #tpu.memory_space<vmem>>, vector<1x4x256xf32>
    %86 = vector.shape_cast %85 : vector<1x4x256xf32> to vector<4x256xf32>
    %87 = vector.shape_cast %84 : vector<4x256xf32> to vector<1x4x256xf32>
    tpu.vector_store %arg4[%c0_55, %c0_56, %c0_57], %87 {strides = array<i32>} : memref<1x4x256xf32, #tpu.memory_space<vmem>>, vector<1x4x256xf32>,
    return
  }
  func.func @transform_0(%arg0: i32) -> (i32, i32, i32) {
    %c0_i32 = arith.constant 0 : i32
    %c0_i32_0 = arith.constant 0 : i32
    %c0_i32_1 = arith.constant 0 : i32
    return %arg0, %c0_i32, %c0_i32_0 : i32, i32, i32
  }
  func.func @transform_1(%arg0: i32) -> (i32, i32, i32) {
    %c0_i32 = arith.constant 0 : i32
    %c0_i32_0 = arith.constant 0 : i32
    %c0_i32_1 = arith.constant 0 : i32
    %c0_i32_2 = arith.constant 0 : i32
    return %c0_i32, %c0_i32_0, %c0_i32_1 : i32, i32, i32
  }
  func.func @transform_2(%arg0: i32) -> (i32, i32) {
    %c0_i32 = arith.constant 0 : i32
    %c0_i32_0 = arith.constant 0 : i32
    %c0_i32_1 = arith.constant 0 : i32
    return %c0_i32, %c0_i32_0 : i32, i32
  }
  func.func @transform_3(%arg0: i32) -> (i32, i32, i32) {
    %c0_i32 = arith.constant 0 : i32
    %c0_i32_0 = arith.constant 0 : i32
    %c0_i32_1 = arith.constant 0 : i32
    return %arg0, %c0_i32, %c0_i32_0 : i32, i32, i32
  }
}

</mosaic_0001>

<bundles_post_ra>
// kernel: path_sampling_layer_choice.1
= control target key start
LH: loop header
LB: loop body
LE: loop exit
PB: predicated region body
PF: predicated region fallthrough
CT: control target
= control target key end

     0   :  { %s1232_s12 = smov 0   ;;  %s1328_s0 = inlined_call_operand.vmem [shape: f32[2,4,290], index: 0, kind: input, shape index: {}]   ;;  %s1329_s1 = inlined_call_operand.vmem [shape: f32[9,4,4], index: 1, kind: input, shape index: {}]   ;;  %s1330_s2 = inlined_call_operand.vmem [shape: f32[4,1], index: 2, kind: input, shape index: {}]   ;;  %s1331_s3 = inlined_call_operand.vmem [shape: f32[2,4,256], index: 3, kind: output, shape index: {}]  }
   0x1 LB: > { %s1115_s13 = sadd.s32 4294967295, %s1200_s12   ;;  %p1119_p0 = scmp.ge.s32.totalorder %s1200_s12, 1  ;;  %s1200_s12 = sphi %s1232_s12, %s13_s12  }
   0x2   : > { %p137_p1 = scmp.lt.s32.totalorder %s1200_s12, 3 }
   0x4   : > { %p138_p2 = pnand %p1119_p0, %p137_p1 }
   0x5   : > { %p161_p3 = scmp.lt.s32.totalorder (!%p138_p2), %s1115_s13, 1  ;;  %v1202_v0 = vmov (!%p138_p2), 0.0   ;;  %vm223_vm0 = vcmask (!%p138_p2), 1043456   ;;  %s1203_s18 = smov (!%p138_p2), 112   ;;  %v202_v5 = vld [vmem:[%s1329_s1] sm:$0xf] (!%p138_p2) }
   0x6   : > { %141 = sbr.rel (%p138_p2) target bundleno = 401 (0x191), region = 32  ;;  %370 = vmatprep.mubr.f32.mxu0 (!%p138_p2), %v1202_v0  ;;  %292 = vmatprep.mubr.f32.mxu1 (!%p138_p2), %v1202_v0  ;;  %vm219_vm1 = vcmask (!%p138_p2), 31744   ;;  %s1204_s21 = smov (!%p138_p2), 96   ;;  %v1209_v9 = vmov (!%p138_p2), 0   ;;  %v1047_v11 = vld [vmem:[%s1330_s2] sm:$0xf] (!%p138_p2) }
   0x7   : > { %s1205_s22 = smov (!%p138_p2), 111   ;;  %s1206_s23 = smov (!%p138_p2), 110   ;;  %1192 = vset.pattern.permute.xlu0 (!%p138_p2), %v1209_v9  ;;  %vm390_vm2 = vcmask (!%p138_p2), 785408   ;;  %vm216_vm3 = vcmask (!%p138_p2), 916480   ;;  %v1123_v22 = vld [vmem:[%s1329_s1 + $0xc] sm:$0xf] (!%p138_p2) }
   0x8   : > { %s1207_s24 = smov (!%p138_p2), 127   ;;  %s1208_s25 = smov (!%p138_p2), 126   ;;  %v1130_v23 = vld [vmem:[%s1329_s1 + $0x18] sm:$0xf] (!%p138_p2)  ;;  %vm488_vm4 = vcmask (!%p138_p2), 908288   ;;  %vm767_vm5 = vcmask (!%p138_p2), 900096  }
   0x9   : > { %s1210_s26 = smov (!%p138_p2), 95   ;;  %s1211_s27 = smov (!%p138_p2), 94   ;;  %v1135_v29 = vld [vmem:[%s1329_s1 + $0x10] sm:$0xf] (!%p138_p2)  ;;  %v1147_v35 = vld [vmem:[%s1329_s1 + $0x14] sm:$0xf] (!%p138_p2) }
   0xa   : > { %vm575_vm6 = vcmask (!%p138_p2), 1039360   ;;  %v1134_v41 = vld [vmem:[%s1329_s1 + $0x4] sm:$0xf] (!%p138_p2)  ;;  %vm854_vm7 = vcmask (!%p138_p2), 1031168   ;;  %v1146_v47 = vld [vmem:[%s1329_s1 + $0x8] sm:$0xf] (!%p138_p2) }
   0xb   : > { %vm669_vm8 = vcmask (!%p138_p2), 777216   ;;  %v1142_v53 = vld [vmem:[%s1329_s1 + $0x1c] sm:$0xf] (!%p138_p2)  ;;  %vm948_vm9 = vcmask (!%p138_p2), 769024   ;;  %v1154_v59 = vld [vmem:[%s1329_s1 + $0x20] sm:$0xf] (!%p138_p2) }
   0xd   : > { %s1333_s13 = smov (!%p161_p3, %s1115_s13), 1 }
   0xe   : > { %s1173_s14 = smul.u32 12, %s1333_s13 }
  0x10   : > { %s1248_s17 = scalar_lea.vmem %s1328_s0, %s1173_s14 }
  0x11   : > { %v206_v1 = vld [vmem:[%s1248_s17 + $0x8] sm:$0xf]  ;;  %v203_v2 = vld [vmem:[%s1248_s17] sm:$0xff] }
  0x12   : > { %214 = vrot.lane.b32.xlu0 %v206_v1, %s1203_s18  ;;  %210 = vrot.lane.b32.xlu1 %v203_v2, %s1203_s18  ;;  %v383_v3 = vcombine.high %v203_v2, %v203_v2  ;;  %v380_v4 = vld [vmem:[%s1248_s17 + $0x8] sm:$0xf] }
  0x13   : > { %v476_v6 = vld [vmem:[%s1248_s17 + $0x8] sm:$0xf] }
  0x14   : > { %1127 = vmatprep.subr.msk.mxu0 %vm223_vm0, %v383_v3  ;;  %v755_v7 = vld [vmem:[%s1248_s17 + $0x8] sm:$0xf] }
  0x15   : > { %1128 = vmatpush1.msk.msra.mxu0 %vm223_vm0, %v203_v2  ;;  %v659_v8 = vld [vmem:[%s1248_s17 + $0x8] sm:$0xf] }
  0x16   : > { %388 = vrot.lane.b32.xlu0 %v380_v4, %s1204_s21  ;;  %384 = vrot.lane.b32.xlu1 %v203_v2, %s1204_s21  ;;  %v938_v10 = vld [vmem:[%s1248_s17 + $0x8] sm:$0xf] }
  0x17   : > { %1129 = vmatmul.mubr.msk.f32.vlgmr.msra.gmra.mrb[0].mxu0 %vm219_vm1, %v202_v5 }
  0x18   : > { %464 = vmatprep.mubr.f32.mxu0 %v1202_v0 }
  0x1a   : > { %386 = vrot.lane.b32.xlu1 %v383_v3, %s1204_s21  ;;  %212 = vrot.lane.b32.xlu0 %v383_v3, %s1203_s18  ;;  %s1160_s21 = sshll.u32 %s1333_s13, 3 }
  0x1e   : > { %486 = vrot.lane.b32.xlu1 %v476_v6, %s1205_s22  ;;  %484 = vrot.lane.b32.xlu0 %v383_v3, %s1205_s22 }
  0x22   : > { %763 = vrot.lane.b32.xlu1 %v383_v3, %s1206_s23  ;;  %482 = vrot.lane.b32.xlu0 %v203_v2, %s1205_s22 }
  0x26   : > { %761 = vrot.lane.b32.xlu1 %v203_v2, %s1206_s23  ;;  %765 = vrot.lane.b32.xlu0 %v755_v7, %s1206_s23 }
  0x2a   : > { %573 = vrot.lane.b32.xlu1 %v476_v6, %s1207_s24  ;;  %571 = vrot.lane.b32.xlu0 %v383_v3, %s1207_s24 }
  0x2e   : > { %850 = vrot.lane.b32.xlu1 %v383_v3, %s1208_s25  ;;  %569 = vrot.lane.b32.xlu0 %v203_v2, %s1207_s24  ;;  %s170_s24 = scalar_lea.vmem %s1331_s3, %s1160_s21 }
  0x32   : > { %848 = vrot.lane.b32.xlu1 %v203_v2, %s1208_s25  ;;  %852 = vrot.lane.b32.xlu0 %v755_v7, %s1208_s25 }
  0x36   : > { %667 = vrot.lane.b32.xlu1 %v659_v8, %s1210_s26  ;;  %665 = vrot.lane.b32.xlu0 %v383_v3, %s1210_s26 }
  0x3a   : > { %944 = vrot.lane.b32.xlu1 %v383_v3, %s1211_s27  ;;  %663 = vrot.lane.b32.xlu0 %v203_v2, %s1210_s26 }
  0x3e   : > { %942 = vrot.lane.b32.xlu1 %v203_v2, %s1211_s27  ;;  %946 = vrot.lane.b32.xlu0 %v938_v10, %s1211_s27  ;;  %v171_v2 = vlaneseq }
  0x40   : > { %v172_v3 = vand.u32 127, %v171_v2 }
  0x42   : > { %1050 = vperm.xlu0 %1192, %v1047_v11   ;;  %v173_v4 = vadd.s32 128, %v172_v3  ;;  %v178_v5 = vand.u32 15, %v172_v3 }
  0x44   : > { %v185_v6 = vand.u32 15, %v173_v4  ;;  %vm198_vm10 = vcmp.ne.s32.totalorder %v178_v5, 0  ;;  %vm200_vm12 = vcmp.ne.s32.totalorder %v178_v5, 15 }
  0x46   : > { %vm199_vm11 = vcmp.ne.s32.totalorder %v185_v6, 0  ;;  %vm201_vm13 = vcmp.ne.s32.totalorder %v185_v6, 15 }
  0x84   : > { %v215_v12 = vpop.permute.xlu0 %214  ;;  %v211_v13 = vpop.permute.xlu1 %210 }
  0x88   : > { %v389_v14 = vpop.permute.xlu0 %388  ;;  %v385_v15 = vpop.permute.xlu1 %384 }
  0x8c   : > { %v387_v16 = vpop.permute.xlu1 %386  ;;  %v213_v17 = vpop.permute.xlu0 %212 }
  0x8d   : > { %v391_v18 = vsel %vm390_vm2, %v385_v15, %v387_v16  ;;  %v392_v19 = vsel %vm390_vm2, %v387_v16, %v389_v14  ;;  %v218_v20 = vsel %vm216_vm3, %v213_v17, %v215_v12  ;;  %v217_v21 = vsel %vm216_vm3, %v211_v13, %v213_v17 }
  0x8e   : > { %1124 = vmatprep.subr.msk.mxu1 %vm223_vm0, %v218_v20  ;;  %1131 = vmatprep.subr.msk.mxu0 %vm223_vm0, %v392_v19 }
  0x8f   : > { %1125 = vmatpush1.msk.msra.mxu1 %vm223_vm0, %v217_v21  ;;  %1132 = vmatpush1.msk.msra.mxu0 %vm223_vm0, %v391_v18 }
  0x90   : > { %v487_v24 = vpop.permute.xlu1 %486  ;;  %v485_v25 = vpop.permute.xlu0 %484  ;;  %1126 = vmatmul.mubr.msk.f32.vlgmr.msra.gmra.mrb[0].mxu1 %vm219_vm1, %v1123_v22  ;;  %1133 = vmatmul.mubr.msk.f32.vlgmr.msra.gmra.mrb[0].mxu0 %vm219_vm1, %v1130_v23 }
  0x91   : > { %v490_v26 = vsel %vm488_vm4, %v485_v25, %v487_v24  ;;  %562 = vmatprep.mubr.f32.mxu1 %v1202_v0  ;;  %841 = vmatprep.mubr.f32.mxu0 %v1202_v0 }
  0x92   : > { %1136 = vmatprep.subr.msk.mxu1 %vm223_vm0, %v490_v26 }
  0x94   : > { %v764_v27 = vpop.permute.xlu1 %763  ;;  %v483_v28 = vpop.permute.xlu0 %482 }
  0x95   : > { %v489_v30 = vsel %vm488_vm4, %v483_v28, %v485_v25 }
  0x96   : > { %1137 = vmatpush1.msk.msra.mxu1 %vm223_vm0, %v489_v30 }
  0x97   : > { %1138 = vmatmul.mubr.msk.f32.vlgmr.msra.gmra.mrb[2].mxu1 %vm219_vm1, %v1135_v29 }
  0x98   : > { %v762_v31 = vpop.permute.xlu1 %761  ;;  %v766_v32 = vpop.permute.xlu0 %765  ;;  %649 = vmatprep.mubr.f32.mxu1 %v1202_v0 }
  0x99   : > { %v768_v33 = vsel %vm767_vm5, %v762_v31, %v764_v27  ;;  %v769_v34 = vsel %vm767_vm5, %v764_v27, %v766_v32 }
  0x9a   : > { %1148 = vmatprep.subr.msk.mxu0 %vm223_vm0, %v769_v34 }
  0x9b   : > { %1149 = vmatpush1.msk.msra.mxu0 %vm223_vm0, %v768_v33 }
  0x9c   : > { %v574_v36 = vpop.permute.xlu1 %573  ;;  %v572_v37 = vpop.permute.xlu0 %571  ;;  %1150 = vmatmul.mubr.msk.f32.vlgmr.msra.gmra.mrb[2].mxu0 %vm219_vm1, %v1147_v35 }
  0x9d   : > { %v577_v38 = vsel %vm575_vm6, %v572_v37, %v574_v36  ;;  %928 = vmatprep.mubr.f32.mxu0 %v1202_v0 }
  0x9e   : > { %1139 = vmatprep.subr.msk.mxu1 %vm223_vm0, %v577_v38 }
  0xa0   : > { %v851_v39 = vpop.permute.xlu1 %850  ;;  %v570_v40 = vpop.permute.xlu0 %569 }
  0xa1   : > { %v576_v42 = vsel %vm575_vm6, %v570_v40, %v572_v37 }
  0xa2   : > { %1140 = vmatpush1.msk.msra.mxu1 %vm223_vm0, %v576_v42 }
  0xa3   : > { %1141 = vmatmul.mubr.msk.f32.vlgmr.msra.gmra.mrb[2].mxu1 %vm219_vm1, %v1134_v41 }
  0xa4   : > { %v849_v43 = vpop.permute.xlu1 %848  ;;  %v853_v44 = vpop.permute.xlu0 %852  ;;  %743 = vmatprep.mubr.f32.mxu1 %v1202_v0 }
  0xa5   : > { %v855_v45 = vsel %vm854_vm7, %v849_v43, %v851_v39  ;;  %v856_v46 = vsel %vm854_vm7, %v851_v39, %v853_v44 }
  0xa6   : > { %1151 = vmatprep.subr.msk.mxu0 %vm223_vm0, %v856_v46 }
  0xa7   : > { %1152 = vmatpush1.msk.msra.mxu0 %vm223_vm0, %v855_v45 }
  0xa8   : > { %v668_v48 = vpop.permute.xlu1 %667  ;;  %v666_v49 = vpop.permute.xlu0 %665  ;;  %1153 = vmatmul.mubr.msk.f32.vlgmr.msra.gmra.mrb[2].mxu0 %vm219_vm1, %v1146_v47 }
  0xa9   : > { %v671_v50 = vsel %vm669_vm8, %v666_v49, %v668_v48  ;;  %1022 = vmatprep.mubr.f32.mxu0 %v1202_v0 }
  0xaa   : > { %1143 = vmatprep.subr.msk.mxu1 %vm223_vm0, %v671_v50 }
  0xac   : > { %v945_v51 = vpop.permute.xlu1 %944  ;;  %v664_v52 = vpop.permute.xlu0 %663 }
  0xad   : > { %v670_v54 = vsel %vm669_vm8, %v664_v52, %v666_v49 }
  0xae   : > { %1144 = vmatpush1.msk.msra.mxu1 %vm223_vm0, %v670_v54 }
  0xaf   : > { %1145 = vmatmul.mubr.msk.f32.vlgmr.msra.gmra.mrb[2].mxu1 %vm219_vm1, %v1142_v53 }
  0xb0   : > { %v943_v55 = vpop.permute.xlu1 %942  ;;  %v947_v56 = vpop.permute.xlu0 %946 }
  0xb1   : > { %v949_v57 = vsel %vm948_vm9, %v943_v55, %v945_v51  ;;  %v950_v58 = vsel %vm948_vm9, %v945_v51, %v947_v56 }
  0xb2   : > { %1155 = vmatprep.subr.msk.mxu0 %vm223_vm0, %v950_v58 }
  0xb3   : > { %1156 = vmatpush1.msk.msra.mxu0 %vm223_vm0, %v949_v57 }
  0xb4   : > { %1157 = vmatmul.mubr.msk.f32.vlgmr.msra.gmra.mrb[2].mxu0 %vm219_vm1, %v1154_v59 }
  0xc1   : > { %v1051_v16 = vpop.permute.xlu0 %1050 }
 0x163   : > { %v294_v60 = vpop.f32.mrb[0].mxu1  ;;  %v466_v61 = vpop.f32.mrb[0].mxu0 }
 0x164   : > { %v1161_v62 = vadd.f32 %v466_v61, %v294_v60  ;;  %v296_v63 = vpop.f32.mrb[1].mxu1  ;;  %v468_v0 = vpop.f32.mrb[1].mxu0 }
 0x165   : > { %v1162_v1 = vadd.f32 %v468_v0, %v296_v63 }
 0x166   : > { %v1035_v8 = vsel %vm198_vm10, %v1161_v62, 0.0 }
 0x167   : > { %v1036_v11 = vsel %vm199_vm11, %v1162_v1, 0.0 }
 0x182   : > { %v745_v7 = vpop.f32.mrb[2].mxu1 }
 0x183   : > { %v1037_v9 = vadd.f32 %v1035_v8, %v745_v7  ;;  %v747_v10 = vpop.f32.mrb[3].mxu1 }
 0x184   : > { %v1038_v12 = vadd.f32 %v1036_v11, %v747_v10 }
 0x187   : > { %v1024_v13 = vpop.f32.mrb[2].mxu0 }
 0x188   : > { %v1043_v14 = vsel %vm200_vm12, %v1024_v13, 0.0  ;;  %v1026_v15 = vpop.f32.mrb[3].mxu0 }
 0x189   : > { %v1045_v17 = vadd.f32 %v1043_v14, %v1037_v9  ;;  %v1044_v18 = vsel %vm201_vm13, %v1026_v15, 0.0 }
 0x18a   : > { %v1046_v19 = vadd.f32 %v1044_v18, %v1038_v12 }
 0x18b   : > { %v1053_v20 = vadd.f32 %v1051_v16, %v1045_v17 }
 0x18c   : > { %v1054_v21 = vadd.f32 %v1051_v16, %v1046_v19 }
 0x18e   : > { %v1057_v22 = vcombine.low %v1053_v20, %v1054_v21 }
 0x190   : > { %1059 = vst [vmem:[%s170_s24] sm:$0xff] %v1057_v22 }
 0x191 PF: > { %s13_s12 = sadd.s32 1, %s1200_s12  }
 0x192   : > { %p10_p4 = scmp.ge.s32.totalorder %s13_s12, 4  }
 0x194   :  { %12 = sbr.rel (!%p10_p4) target bundleno = 1 (0x1), region = 70 }

</bundles_post_ra>
